<compile_context>
chip_gen: v6e
topology: v6e:2x2x1
jax: 0.10.0
libtpu: 0.0.40
codegen_flags: <defaults>
</compile_context>

<pallas_src>
import functools

import jax
import jax.numpy as jnp
from jax.experimental import pallas as pl
from jax.experimental.pallas import tpu as pltpu

EPS = 1e-5
MOMENTUM = 0.9
_MAX_FULL_D = 1024          # feature dims up to this use one full-extent lane block
_WIDE_TILE_D = 512          # lane tile for very wide feature dims


def _cdiv(a, b):
    return -(-a // b)


def _round_up(a, b):
    return ((a + b - 1) // b) * b


def _vmem_budget():
    """Generation-aware scoped-VMEM limit and tile budget (bytes)."""
    try:
        cap = pltpu.get_tpu_info().vmem_capacity_bytes
    except Exception:
        cap = 64 * 1024 * 1024          # conservative fallback (v7x per-TC size)
    limit = int(cap * 0.625)            # ~40 MiB on v7x, ~80 MiB on v5e/v6e
    tile_budget = int(cap * 0.45)       # what the double-buffered blocks may use
    return limit, tile_budget


def _choose_tiles(n, d, itemsize, tile_budget):
    """Pick (tile_n, tile_d, grid) so the double-buffered x-in + y-out blocks
    fit the VMEM budget and the pipeline has multiple steps when work allows."""
    # Feature tile: full extent for moderate D (no padding; bypasses the
    # 128-lane divisibility rule), 512-lane tiles for very wide D.
    tile_d = d if d <= _MAX_FULL_D else _WIDE_TILE_D
    grid_d = _cdiv(d, tile_d)

    # Batch tile: largest multiple of 8 whose double-buffered in+out blocks fit.
    row_bytes = 4 * 2 * tile_d * 4                 # scale/bias/stat rows (f32, dbl-buf)
    per_batch_row = 2 * tile_d * itemsize * 2      # (x in + y out) x double-buffer
    avail = max(tile_budget - row_bytes, per_batch_row * 8)
    max_tn = max(8, (avail // per_batch_row) // 8 * 8)

    tile_n = n if n <= max_tn else max_tn
    grid_n = _cdiv(n, tile_n)

    # Keep >= ~4 total pipeline steps when there is enough work to amortize them.
    if grid_d * grid_n < 4 and n >= 32:
        want_n = max(2, _cdiv(4, grid_d))
        tile_n = min(tile_n, max(8, _round_up(_cdiv(n, want_n), 8)))
        grid_n = _cdiv(n, tile_n)

    block_bytes = per_batch_row * tile_n + row_bytes
    assert block_bytes <= tile_budget or tile_n <= 8, (
        f"tile selection overflowed the VMEM budget ({block_bytes} > {tile_budget})")

    mask_rows = (n % tile_n) != 0
    return tile_n, tile_d, grid_d, grid_n, mask_rows


def _stats_kernel(x_ref, sum_ref, sumsq_ref, *, n_rows, mask_rows):
    """Training pass 1: per-feature sum / sum-of-squares over the batch.

    Grid = (feature tiles [parallel], batch tiles [arbitrary, last]).
    sum_ref / sumsq_ref are (1, TILE_D) resident accumulators (the output
    block index is constant across the batch axis for a given feature tile).
    """
    jn = pl.program_id(1)

    @pl.when(jn == 0)
    def _():
        sum_ref[...] = jnp.zeros_like(sum_ref)
        sumsq_ref[...] = jnp.zeros_like(sumsq_ref)

    x = x_ref[...].astype(jnp.float32)
    if mask_rows:                      # static: only when N % TILE_N != 0
        tile_n = x.shape[0]
        row = jn * tile_n + jax.lax.broadcasted_iota(jnp.int32, x.shape, 0)
        x = jnp.where(row < n_rows, x, 0.0)
    sum_ref[...] += jnp.sum(x, axis=0, keepdims=True)
    sumsq_ref[...] += jnp.sum(x * x, axis=0, keepdims=True)


def _scale_bias_kernel(x_ref, scale_ref, bias_ref, y_ref):
    """Training pass 2 / eval: y = x * scale + bias (one FMA per element)."""
    y_ref[...] = (x_ref[...].astype(jnp.float32) * scale_ref[...]
                  + bias_ref[...]).astype(y_ref.dtype)


def batchnorm_forward(x, log_gamma, beta, running_mean, running_var,
                      training=True, expand_log_det=False):
    """RealNVP BatchNorm.forward.

    Returns (y, log_abs_det_jacobian, new_running_mean, new_running_var).
    log_abs_det_jacobian is the per-feature (D,) row by default (torch's
    .expand_as(x) is a zero-copy broadcast view); pass expand_log_det=True to
    materialize the dense (N, D) version.  The running-stat EMA is returned
    instead of mutated in place.
    """
    n, d = x.shape
    limit, tile_budget = _vmem_budget()
    tile_n, tile_d, grid_d, grid_n, mask_rows = _choose_tiles(
        n, d, x.dtype.itemsize, tile_budget)

    grid = (grid_d, grid_n)
    xspec = pl.BlockSpec((tile_n, tile_d), lambda jd, jn: (jn, jd))
    rowspec = pl.BlockSpec((1, tile_d), lambda jd, jn: (0, jd))

    if training:
        s, ss = pl.pallas_call(
            functools.partial(_stats_kernel, n_rows=n, mask_rows=mask_rows),
            out_shape=(jax.ShapeDtypeStruct((1, d), jnp.float32),
                       jax.ShapeDtypeStruct((1, d), jnp.float32)),
            grid=grid,
            in_specs=[xspec],
            out_specs=(rowspec, rowspec),
            compiler_params=pltpu.CompilerParams(
                dimension_semantics=("parallel", "arbitrary"),
                vmem_limit_bytes=limit),
        )(x)
        mean = s[0] / n
        # Unbiased variance, matching torch.Tensor.var(0) (ddof=1).  For n == 1
        # this divides by zero, mirroring torch's NaN-style behaviour.
        var = (ss[0] - n * mean * mean) / jnp.float32(n - 1)
        new_rm = running_mean * MOMENTUM + mean.astype(running_mean.dtype) * (1.0 - MOMENTUM)
        new_rv = running_var * MOMENTUM + var.astype(running_var.dtype) * (1.0 - MOMENTUM)
    else:
        mean = running_mean.astype(jnp.float32)
        var = running_var.astype(jnp.float32)
        new_rm, new_rv = running_mean, running_var

    # Per-feature scale / bias / log-det rows (D-length math; negligible).
    inv_std = jax.lax.rsqrt(var + EPS)
    scale = jnp.exp(log_gamma.astype(jnp.float32)) * inv_std
    bias = beta.astype(jnp.float32) - mean * scale
    log_det = log_gamma.astype(jnp.float32) - 0.5 * jnp.log(var + EPS)

    y = pl.pallas_call(
        _scale_bias_kernel,
        out_shape=jax.ShapeDtypeStruct((n, d), x.dtype),
        grid=grid,
        in_specs=[xspec, rowspec, rowspec],
        out_specs=xspec,
        compiler_params=pltpu.CompilerParams(
            dimension_semantics=("parallel", "parallel"),
            vmem_limit_bytes=limit),
    )(x, scale.reshape(1, d), bias.reshape(1, d))

    if expand_log_det:
        log_det = jnp.broadcast_to(log_det, x.shape)
    return y, log_det, new_rm, new_rv


# TODO(synk): BatchNorm.inverse() is not implemented (forward pass only, per task scope).


def _reference(x, log_gamma, beta, mean, var):
    x_hat = (x - mean) / jnp.sqrt(var + EPS)
    y = jnp.exp(log_gamma) * x_hat + beta
    ldj = log_gamma - 0.5 * jnp.log(var + EPS)
    return y, ldj


if __name__ == "__main__":
    key = jax.random.PRNGKey(0)

    def check(n, d, tag):
        kx, kg, kb, km, kv = jax.random.split(
            jax.random.fold_in(key, n * 1000 + d), 5)
        x = jax.random.normal(kx, (n, d), dtype=jnp.float32)
        log_gamma = 0.1 * jax.random.normal(kg, (d,), dtype=jnp.float32)
        beta = 0.1 * jax.random.normal(kb, (d,), dtype=jnp.float32)
        running_mean = 0.05 * jax.random.normal(km, (d,), dtype=jnp.float32)
        running_var = 1.0 + 0.1 * jax.random.uniform(kv, (d,), dtype=jnp.float32)

        # ---- training mode ----
        y, ldj, new_rm, new_rv = batchnorm_forward(
            x, log_gamma, beta, running_mean, running_var, training=True)
        jax.block_until_ready((y, ldj, new_rm, new_rv))

        bmean = x.mean(0)
        bvar = x.var(0, ddof=1)
        y_ref, ldj_ref = _reference(x, log_gamma, beta, bmean, bvar)
        rm_ref = running_mean * MOMENTUM + bmean * (1.0 - MOMENTUM)
        rv_ref = running_var * MOMENTUM + bvar * (1.0 - MOMENTUM)

        assert jnp.allclose(y, y_ref, atol=1e-4), f"[{tag}] y mismatch (train)"
        assert jnp.allclose(ldj, ldj_ref, atol=1e-4), f"[{tag}] log-det mismatch (train)"
        assert jnp.allclose(new_rm, rm_ref, atol=1e-5), f"[{tag}] running_mean mismatch"
        assert jnp.allclose(new_rv, rv_ref, atol=1e-5), f"[{tag}] running_var mismatch"

        # ---- eval mode ----
        y_e, ldj_e, _, _ = batchnorm_forward(
            x, log_gamma, beta, running_mean, running_var, training=False)
        jax.block_until_ready((y_e, ldj_e))

        y_e_ref, ldj_e_ref = _reference(x, log_gamma, beta, running_mean, running_var)
        assert jnp.allclose(y_e, y_e_ref, atol=1e-4), f"[{tag}] y mismatch (eval)"
        assert jnp.allclose(ldj_e, ldj_e_ref, atol=1e-4), f"[{tag}] log-det mismatch (eval)"

    check(64, 32, "N=64,D=32")    # even tiling, 4 pipelined batch tiles
    check(60, 48, "N=60,D=48")    # ragged last batch tile (masked stats path)
    print("KERNEL_OK")
</pallas_src>

<mosaic_0001>
module attributes {stable_mosaic.version = 11 : i64} {
  func.func @_stats_kernel(%arg0: i32, %arg1: i32, %arg2: memref<16x32xf32, #tpu.memory_space<vmem>>, %arg3: memref<1x32xf32, #tpu.memory_space<vmem>>, %arg4: memref<1x32xf32, #tpu.memory_space<vmem>>) attributes {dimension_semantics = [#tpu.dimension_semantics<parallel>, #tpu.dimension_semantics<arbitrary>], iteration_bounds = array<i64: 1, 4>, scalar_prefetch = 0 : i64, scratch_operands = 0 : i64, tpu.core_type = #tpu.core_type<tc>, window_params = [{transform_indices = @transform_0, window_bounds = array<i64: 16, 32>}, {transform_indices = @transform_1, window_bounds = array<i64: 1, 32>}, {transform_indices = @transform_2, window_bounds = array<i64: 1, 32>}]} {
    %c0_i32 = arith.constant 0 : i32
    %0 = arith.cmpi eq, %arg1, %c0_i32 : i32
    %1 = arith.extui %0 : i1 to i32
    %c0_i32_0 = arith.constant 0 : i32
    %2 = arith.cmpi ne, %1, %c0_i32_0 : i32
    scf.if %2 {
      %cst_11 = arith.constant 0.000000e+00 : f32
      %15 = vector.broadcast %cst_11 : f32 to vector<1x32xf32>
      %c0_12 = arith.constant 0 : index
      %c0_13 = arith.constant 0 : index
      %16 = vector.load %arg3[%c0_12, %c0_13] : memref<1x32xf32, #tpu.memory_space<vmem>>, vector<1x32xf32>
      tpu.vector_store %arg3[%c0_12, %c0_13], %15 {strides = array<i32>} : memref<1x32xf32, #tpu.memory_space<vmem>>, vector<1x32xf32>,
      %cst_14 = arith.constant 0.000000e+00 : f32
      %17 = vector.broadcast %cst_14 : f32 to vector<1x32xf32>
      %c0_15 = arith.constant 0 : index
      %c0_16 = arith.constant 0 : index
      %18 = vector.load %arg4[%c0_15, %c0_16] : memref<1x32xf32, #tpu.memory_space<vmem>>, vector<1x32xf32>
      tpu.vector_store %arg4[%c0_15, %c0_16], %17 {strides = array<i32>} : memref<1x32xf32, #tpu.memory_space<vmem>>, vector<1x32xf32>,
    } else {
    }
    %c0 = arith.constant 0 : index
    %c0_1 = arith.constant 0 : index
    %3 = vector.load %arg2[%c0, %c0_1] : memref<16x32xf32, #tpu.memory_space<vmem>>, vector<16x32xf32>
    %c0_2 = arith.constant 0 : index
    %c0_3 = arith.constant 0 : index
    %4 = vector.load %arg3[%c0_2, %c0_3] : memref<1x32xf32, #tpu.memory_space<vmem>>, vector<1x32xf32>
    %cst = arith.constant dense<0.000000e+00> : vector<32xf32>
    %5 = vector.multi_reduction <add>, %3, %cst [0] : vector<16x32xf32> to vector<32xf32>
    %6 = vector.shape_cast %5 : vector<32xf32> to vector<1x32xf32>
    %7 = arith.addf %4, %6 : vector<1x32xf32>
    %c0_4 = arith.constant 0 : index
    %c0_5 = arith.constant 0 : index
    %8 = vector.load %arg3[%c0_4, %c0_5] : memref<1x32xf32, #tpu.memory_space<vmem>>, vector<1x32xf32>
    tpu.vector_store %arg3[%c0_4, %c0_5], %7 {strides = array<i32>} : memref<1x32xf32, #tpu.memory_space<vmem>>, vector<1x32xf32>,
    %c0_6 = arith.constant 0 : index
    %c0_7 = arith.constant 0 : index
    %9 = vector.load %arg4[%c0_6, %c0_7] : memref<1x32xf32, #tpu.memory_space<vmem>>, vector<1x32xf32>
    %10 = arith.mulf %3, %3 : vector<16x32xf32>
    %cst_8 = arith.constant dense<0.000000e+00> : vector<32xf32>
    %11 = vector.multi_reduction <add>, %10, %cst_8 [0] : vector<16x32xf32> to vector<32xf32>
    %12 = vector.shape_cast %11 : vector<32xf32> to vector<1x32xf32>
    %13 = arith.addf %9, %12 : vector<1x32xf32>
    %c0_9 = arith.constant 0 : index
    %c0_10 = arith.constant 0 : index
    %14 = vector.load %arg4[%c0_9, %c0_10] : memref<1x32xf32, #tpu.memory_space<vmem>>, vector<1x32xf32>
    tpu.vector_store %arg4[%c0_9, %c0_10], %13 {strides = array<i32>} : memref<1x32xf32, #tpu.memory_space<vmem>>, vector<1x32xf32>,
    return
  }
  func.func @transform_0(%arg0: i32, %arg1: i32) -> (i32, i32) {
    %c0_i32 = arith.constant 0 : i32
    return %arg1, %arg0 : i32, i32
  }
  func.func @transform_1(%arg0: i32, %arg1: i32) -> (i32, i32) {
    %c0_i32 = arith.constant 0 : i32
    %c0_i32_0 = arith.constant 0 : i32
    return %c0_i32, %arg0 : i32, i32
  }
  func.func @transform_2(%arg0: i32, %arg1: i32) -> (i32, i32) {
    %c0_i32 = arith.constant 0 : i32
    %c0_i32_0 = arith.constant 0 : i32
    return %c0_i32, %arg0 : i32, i32
  }
}

</mosaic_0001>

<bundles_post_ra>
// kernel: tpu_custom_call.1
= control target key start
LH: loop header
LB: loop body
LE: loop exit
PB: predicated region body
PF: predicated region fallthrough
CT: control target
= control target key end

     0   :  { %8 = vsyncpa [#allocation3], 0  ;;  %s500_s0 = inlined_call_operand.vmem [shape: f32[64,32], index: 0, kind: input, shape index: {}]   ;;  %s501_s1 = inlined_call_operand.hbm [shape: f32[1,32], index: 1, kind: output, shape index: {0}]   ;;  %s502_s2 = inlined_call_operand.hbm [shape: f32[1,32], index: 2, kind: output, shape index: {1}]  }
   0x1   :  { %9 = vsyncpa [#allocation5], 0  ;;  %s439_s9 = smov 0   ;;  %s441_s10 = smov 0  }
   0x2   :  { %s443_s11 = smov 0  }
   0x3 LB: > { %s289_s12 = sadd.s32 4294967295, %s419_s11   ;;  %s24_s13 = sadd.s32 1, %s415_s10  ;;  %s419_s11 = sphi %s443_s11, %s15_s11   ;;  %s415_s10 = sphi %s441_s10, %s505_s10   ;;  %s411_s9 = sphi %s439_s9, %s504_s9  }
   0x4   : > { %p25_p0 = scmp.ge.s32.totalorder %s24_s13, 4  ;;  %p292_p1 = scmp.ge.s32.totalorder %s419_s11, 1 }
   0x5   : > { %p135_p2 = scmp.lt.s32.totalorder %s419_s11, 5 }
   0x6   : > { %s507_s13 = smov (%p25_p0, %s24_s13), 0 }
   0x7   : > { %p136_p3 = pnand %p292_p1, %p135_p2 }
   0x8   : > { %s293_s14 = sshll.u32 (!%p136_p3), %s411_s9, 1  ;;  %p295_p5 = scmp.ne.s32.totalorder (!%p136_p3), %s411_s9, 0 }
   0x9   : > { %139 = sbr.rel (%p136_p3) target bundleno = 57 (0x39), region = 24  ;;  %p156_p4 = scmp.lt.s32.totalorder (!%p136_p3), %s293_s14, 7 }
   0xe   : > { %s509_s14 = smov (!%p156_p4, %s293_s14), 7  ;;  %167 = sbr.rel (%p295_p5) target bundleno = 21 (0x15), region = 28 }
   0xf   : > { %s294_s15 = sshll.u32 %s509_s14, 3 }
  0x10   : > { %s162_s18 = scalar_lea.vmem %s500_s0, %s294_s15 }
  0x13   : > { %vm168_vm0 = vcmask 253952   ;;  %v421_v0 = vmov 0.0  }
  0x14   : > { %169 = vst.msk [vmem:[#allocation2] sm:$0x1] %vm168_vm0, %v421_v0  ;;  %170 = vst.msk [vmem:[#allocation4] sm:$0x1] %vm168_vm0, %v421_v0 }
  0x15 PF: > { %v171_v1 = vld [vmem:[%s162_s18] sm:$0xff]  ;;  %v172_v2 = vld [vmem:[%s162_s18 + $0x8] sm:$0xff]  ;;  %vm174_vm1 = vcmask 261120   ;;  %s422_s19 = smov [#allocation2]   ;;  %vm185_vm2 = vcmask 253952   ;;  %p463_p6 = scmp.eq.s32.totalorder %s289_s12, 3 }
  0x16   : > { %v175_v3 = vsel %vm174_vm1, %v171_v1, 0.0  ;;  %v176_v4 = vsel %vm174_vm1, %v172_v2, 0.0  ;;  %v188_v5 = vmul.f32 %v171_v1, %v171_v1  ;;  %v189_v6 = vmul.f32 %v172_v2, %v172_v2  ;;  %s210_s20 = sshll.u32 %s422_s19, 4  ;;  %s423_s22 = smov [#allocation4]   ;;  %s211_s20 = int_to_ptr.vmem [resolvable:$true] %s210_s20 }
  0x17   : > { %v177_v7 = vadd.f32 %v176_v4, %v175_v3  ;;  %s223_s23 = sshll.u32 %s423_s22, 4  ;;  %s341_s24 = scalar_lea.vmem %s211_s20, 16  ;;  %s224_s23 = int_to_ptr.vmem [resolvable:$true] %s223_s23 }
  0x18   : > { %v190_v8 = vsel %vm174_vm1, %v188_v5, 0.0  ;;  %v191_v9 = vsel %vm174_vm1, %v189_v6, 0.0  ;;  %p342_p7 = scmp.ne.s32.totalorder %s211_s20, %s341_s24  ;;  %s347_s25 = scalar_lea.vmem %s211_s20, 32 }
  0x19   : > { %v178_v10 = vrot.slane %v177_v7, 4  ;;  %v192_v11 = vadd.f32 %v191_v9, %v190_v8  ;;  %p348_p10 = scmp.lt.s32.totalorder %s211_s20, %s211_s20  ;;  %p349_p11 = scmp.lt.s32.totalorder %s347_s25, %s341_s24 }
  0x1a   : > { %p343_p8 = pnand %p342_p7, %p463_p6 }
  0x1b   : > { %v179_v12 = vadd.f32 %v178_v10, %v177_v7  ;;  %v193_v13 = vrot.slane %v192_v11, 4  ;;  %v173_v20 = vld [vmem:[#allocation2] sm:$0x1]  ;;  %v187_v23 = vld [vmem:[#allocation4] sm:$0x1]  ;;  %p350_p12 = por %p349_p11, %p348_p10 }
  0x1c   : > { %p344_p9 = pneg %p343_p8 }
  0x1d   : > { %v180_v14 = vrot.slane %v179_v12, 2  ;;  %v194_v15 = vadd.f32 %v193_v13, %v192_v11 }
  0x1e   : > { %p351_p13 = pnand %p350_p12, %p344_p9 }
  0x1f   : > { %v181_v16 = vadd.f32 %v180_v14, %v179_v12  ;;  %v195_v17 = vrot.slane %v194_v15, 2 }
  0x21   : > { %v182_v18 = vrot.slane %v181_v16, 1  ;;  %v196_v19 = vadd.f32 %v195_v17, %v194_v15 }
  0x23   : > { %v183_v21 = vadd.f32 %v182_v18, %v181_v16  ;;  %v197_v22 = vrot.slane %v196_v19, 1 }
  0x25   : > { %v184_v24 = vadd.f32 %v183_v21, %v173_v20  ;;  %v198_v25 = vadd.f32 %v197_v22, %v196_v19 }
  0x27   : > { %186 = vst.msk [vmem:[#allocation2] sm:$0x1] %vm185_vm2, %v184_v24  ;;  %v199_v26 = vadd.f32 %v198_v25, %v187_v23 }
  0x28   : > { %354 = shalt.err (!%p351_p13)
}
  0x29   : > { %303 = dma.vmem_to_hbm [thread:$0]  (%p463_p6), %s211_s20, 16, %s501_s1, [#allocation3]   ;;  %200 = vst.msk [vmem:[#allocation4] sm:$0x1] %vm185_vm2, %v199_v26 }
  0x2a   : > { %s365_s28 = scalar_lea.vmem %s224_s23, 16  ;;  %s371_s29 = scalar_lea.vmem %s224_s23, 32 }
  0x2b   : > { %p366_p0 = scmp.ne.s32.totalorder %s224_s23, %s365_s28  ;;  %p372_p3 = scmp.lt.s32.totalorder %s224_s23, %s224_s23 }
  0x2c   : > { %p373_p4 = scmp.lt.s32.totalorder %s371_s29, %s365_s28 }
  0x2d   : > { %p367_p1 = pnand %p366_p0, %p463_p6 }
  0x2e   : > { %p374_p5 = por %p373_p4, %p372_p3 }
  0x2f   : > { %p368_p2 = pneg %p367_p1 }
  0x31   : > { %p375_p7 = pnand %p374_p5, %p368_p2 }
  0x33   : > { %378 = shalt.err (!%p375_p7)
}
  0x34   : > { %305 = dma.vmem_to_hbm [thread:$0]  (%p463_p6), %s224_s23, 16, %s502_s2, [#allocation5]  }
  0x35   : > { %402 = dma.done.wait (%p463_p6), [#allocation3], 16  }
  0x36   : > { %404 = vsyncadd (%p463_p6), [#allocation3], 4294967280 }
  0x37   : > { %406 = dma.done.wait (%p463_p6), [#allocation5], 16  }
  0x38   : > { %408 = vsyncadd (%p463_p6), [#allocation5], 4294967280 }
  0x39 PF: > { %s15_s11 = sadd.s32 1, %s419_s11   ;;  %s504_s9 = smov %s415_s10 }
  0x3a   : > { %p12_p8 = scmp.ge.s32.totalorder %s15_s11, 6   ;;  %s505_s10 = smov %s507_s13 }
  0x3c   :  { %14 = sbr.rel (!%p12_p8) target bundleno = 3 (0x3), region = 65 }
  0x41   :  { %240 = vsyncpa [#allocation3], 1 }
  0x42   :  { %242 = vsyncpa [#allocation3 + $0x1], 1 }
  0x43   :  { %243 = vsyncpa [#allocation5], 1 }

</bundles_post_ra>
